<compile_context>
chip_gen: v5e
topology: v5e:2x2
jax: 0.10.0
libtpu: 0.0.40
codegen_flags: <defaults>
</compile_context>

<pallas_src>
import functools

import jax
import jax.numpy as jnp
from jax.experimental import pallas as pl
from jax.experimental.pallas import tpu as pltpu

# ---------------- model hyper-parameters (small, synthetic) ----------------
HIDDEN_DIM = 32
EMBEDDING_DIM = 8
NUM_ITERATIONS = 1
NUM_ITEMS = 64
NUM_CATEGORIES = 5
NUM_SUB_CATEGORIES = 6
NUM_ELEMENTS = 7
NUM_BRANDS = 4
INPUT_DIM = 5 * EMBEDDING_DIM + 1          # price + 5 concatenated embeddings

LANE = 128
NUM_ITEMS_PAD = ((NUM_ITEMS + LANE - 1) // LANE) * LANE   # lane-dense output slab
GATE_DIM = 4 * HIDDEN_DIM                  # [r | z | n_ih | n_hh] == 128 for H=32


# ------------------------------- Pallas kernel ------------------------------
def _sr_gnn_kernel(num_iterations,
                   x_ref, a_ref, pool_ref,
                   wmsg_ref, bmsg_ref,
                   wgru_ref, bgru_ref,
                   wfc_ref, bfc_ref,
                   out_ref):
    f32 = jnp.float32
    bf16 = jnp.bfloat16
    hd = HIDDEN_DIM

    # All matmul operands arrive pre-cast to bf16 from the wrapper; f32
    # accumulation on the MXU; all elementwise / sigmoid / tanh gate math stays
    # f32 (v5e has no bf16 VPU/EUP).
    x = x_ref[...]            # [N, 5E+1] bf16
    a = a_ref[...]            # [N, N]    bf16  row-normalized adjacency
    pool = pool_ref[...]      # [B, N]    bf16  mean-pool matrix
    w_gru = wgru_ref[...]     # [2H, 4H]  bf16  fused gate weights
    b_gru = bgru_ref[...]     # [1, 4H]   f32   fused gate biases

    # message_linear: Linear(5E+1 -> H)
    h = jnp.dot(x, wmsg_ref[...], preferred_element_type=f32) + bmsg_ref[...]   # [N, H] f32

    # Statically unrolled (num_iterations is a Python int) -- equivalent to
    # lax.fori_loop(..., unroll=True) for a static trip count.
    # TODO(synk): for large iteration counts switch to a rolled lax.fori_loop to
    # bound vreg live ranges of the gate temporaries.
    for _ in range(num_iterations):
        hb = h.astype(bf16)
        # propagate(aggr='mean'): messages[i] = mean_{j -> i} h[j]
        m = jnp.dot(a, hb, preferred_element_type=f32).astype(bf16)             # [N, H]
        # Single fused gate matmul per iteration: [N,2H] @ [2H,4H] -> [N,128]
        #   cols [0:H)    = m@W_ir + h@W_hr        (r pre-act, bias b_ir+b_hr)
        #   cols [H:2H)   = m@W_iz + h@W_hz        (z pre-act, bias b_iz+b_hz)
        #   cols [2H:3H)  = m@W_in                 (n input part,  bias b_in)
        #   cols [3H:4H)  = h@W_hn                 (n hidden part, bias b_hn)
        mh = jnp.concatenate([m, hb], axis=1)                                   # [N, 2H]
        g = jnp.dot(mh, w_gru, preferred_element_type=f32) + b_gru              # [N, 4H]
        r = jax.nn.sigmoid(g[:, 0:hd])
        z = jax.nn.sigmoid(g[:, hd:2 * hd])
        n = jnp.tanh(g[:, 2 * hd:3 * hd] + r * g[:, 3 * hd:4 * hd])
        h = (1.0 - z) * n + z * h                                               # [N, H] f32

    # global_mean_pool; dropout is identity in eval mode.
    gmean = jnp.dot(pool, h.astype(bf16), preferred_element_type=f32)           # [B, H]
    # fc into a lane-dense (128-wide) output slab -> unmasked vst stores.
    out_ref[...] = jnp.dot(gmean.astype(bf16), wfc_ref[...],
                           preferred_element_type=f32) + bfc_ref[...]


def sr_gnn_pallas(x, a_norm, pool, packed_params, num_iterations=NUM_ITERATIONS):
    """x: [N, 5E+1] bf16, a_norm: [N, N] bf16, pool: [B, N] bf16
       -> padded scores [B, NUM_ITEMS_PAD] f32."""
    n = x.shape[0]
    b = pool.shape[0]
    hd = HIDDEN_DIM

    operands = (x, a_norm, pool, *packed_params)

    # Advisory cost estimate for the XLA scheduler.
    flops = 2 * n * INPUT_DIM * hd                                      # message_linear
    flops += num_iterations * (2 * n * n * hd                           # A @ h
                               + 2 * n * (2 * hd) * GATE_DIM            # fused gate matmul
                               + 10 * n * hd)                           # gate elementwise
    flops += 2 * b * n * hd + 2 * b * hd * NUM_ITEMS_PAD                # pool + fc
    transcendentals = num_iterations * 3 * n * hd
    out_bytes = 4 * b * NUM_ITEMS_PAD
    bytes_accessed = (sum(int(o.size) * o.dtype.itemsize for o in operands)
                      + out_bytes)

    # Everything is VMEM-resident (no grid -> no double buffering).  Size the
    # scoped limit from actual resident bytes + f32 working set, clamped to the
    # physical per-core VMEM (64 MiB on v7x, 128 MiB on v5e/v6e).
    try:
        vmem_cap = int(getattr(pltpu.get_tpu_info(), "vmem_capacity_bytes", 64 << 20))
    except Exception:  # pragma: no cover - conservative fallback
        vmem_cap = 64 << 20
    working_bytes = 8 * n * LANE * 4            # rough bound on f32 intermediates
    vmem_limit = int(min(vmem_cap, max(4 << 20, 2 * (bytes_accessed + working_bytes))))

    # TODO(synk): at production N (>= a few thousand nodes) do not keep the
    # dense [N,N] adjacency VMEM-resident: add a grid over destination-node
    # blocks with dimension_semantics=("parallel","arbitrary") (parallel axis
    # also feeds the second v7x TensorCore), stream bf16 adjacency tiles from
    # HBM (BlockSpec tiling / pl.Buffered), or scalar-prefetch the edge list
    # into SMEM and segment-sum in-kernel.
    vmem = pl.BlockSpec(memory_space=pltpu.MemorySpace.VMEM)
    kernel = functools.partial(_sr_gnn_kernel, num_iterations)
    return pl.pallas_call(
        kernel,
        out_shape=jax.ShapeDtypeStruct((b, NUM_ITEMS_PAD), jnp.float32),
        in_specs=[vmem] * len(operands),
        out_specs=vmem,
        compiler_params=pltpu.CompilerParams(vmem_limit_bytes=vmem_limit),
        cost_estimate=pl.CostEstimate(flops=flops,
                                      transcendentals=transcendentals,
                                      bytes_accessed=bytes_accessed),
    )(*operands)


# ------------------------------- JAX glue -----------------------------------
def build_params(key):
    ks = jax.random.split(key, 12)

    def u(k, shape, fan_in):
        bound = 1.0 / jnp.sqrt(jnp.float32(fan_in))
        return jax.random.uniform(k, shape, jnp.float32, -bound, bound)

    return {
        # embedding tables
        "emb_cat": jax.random.normal(ks[0], (NUM_CATEGORIES, EMBEDDING_DIM), jnp.float32),
        "emb_sub": jax.random.normal(ks[1], (NUM_SUB_CATEGORIES, EMBEDDING_DIM), jnp.float32),
        "emb_elem": jax.random.normal(ks[2], (NUM_ELEMENTS, EMBEDDING_DIM), jnp.float32),
        "emb_brand": jax.random.normal(ks[3], (NUM_BRANDS, EMBEDDING_DIM), jnp.float32),
        "emb_item": jax.random.normal(ks[4], (NUM_ITEMS, EMBEDDING_DIM), jnp.float32),
        # message_linear: Linear(INPUT_DIM -> HIDDEN_DIM), stored [in, out]
        "w_msg": u(ks[5], (INPUT_DIM, HIDDEN_DIM), INPUT_DIM),
        "b_msg": u(ks[6], (1, HIDDEN_DIM), INPUT_DIM),
        # GRUCell(HIDDEN_DIM, HIDDEN_DIM): gates in (r, z, n) order, stored [in, 3H]
        "w_ih": u(ks[7], (HIDDEN_DIM, 3 * HIDDEN_DIM), HIDDEN_DIM),
        "w_hh": u(ks[8], (HIDDEN_DIM, 3 * HIDDEN_DIM), HIDDEN_DIM),
        "b_ih": u(ks[9], (1, 3 * HIDDEN_DIM), HIDDEN_DIM),
        "b_hh": u(ks[10], (1, 3 * HIDDEN_DIM), HIDDEN_DIM),
        # fc: Linear(HIDDEN_DIM -> NUM_ITEMS), stored [in, out]
        "w_fc": u(ks[11], (HIDDEN_DIM, NUM_ITEMS), HIDDEN_DIM),
        "b_fc": jnp.zeros((1, NUM_ITEMS), jnp.float32),
    }


def _sr_gnn_forward(params, price, category, sub_category, element, brand,
                    product_id, edge_index, batch, num_graphs):
    bf16 = jnp.bfloat16
    hd = HIDDEN_DIM

    # NodeEmbedding: 5 lookups concatenated on the feature axis
    emb = jnp.concatenate([
        params["emb_cat"][category],
        params["emb_sub"][sub_category],
        params["emb_elem"][element],
        params["emb_brand"][brand],
        params["emb_item"][product_id],
    ], axis=1)                                              # [N, 5E]
    # TODO(synk): price is cast to bf16 with the rest of x below; normalize it
    # upstream (or keep a separate f32 column) if price magnitudes are large.
    x = jnp.concatenate([price, emb], axis=1)               # [N, 5E+1]
    n = x.shape[0]

    # Dense row-normalized adjacency for mean aggregation over incoming edges
    # (built in f32 -> exact integer degree counts -> cast to bf16 for the MXU;
    #  zero in-degree rows stay all-zero, matching PyG's mean aggregation).
    src, dst = edge_index[0], edge_index[1]
    a = jnp.zeros((n, n), jnp.float32).at[dst, src].add(1.0)
    deg = a.sum(axis=1, keepdims=True)
    a_norm = jnp.where(deg > 0, a / jnp.maximum(deg, 1.0), 0.0)

    # global_mean_pool matrix
    onehot = (batch[None, :] == jnp.arange(num_graphs)[:, None]).astype(jnp.float32)
    counts = onehot.sum(axis=1, keepdims=True)
    pool = onehot / jnp.maximum(counts, 1.0)                # [B, N]

    # Fuse GRU weights into one [2H, 4H] bf16 matrix:
    #   rows [0:H)  (input  m): [W_ir | W_iz | W_in |  0  ]
    #   rows [H:2H) (hidden h): [W_hr | W_hz |  0   | W_hn]
    # and fuse biases into one [1, 4H] f32 vector [b_ir+b_hr | b_iz+b_hz | b_in | b_hn]
    # (b_hn must stay inside r*(...), hence its own column block).
    w_ih, w_hh = params["w_ih"], params["w_hh"]
    b_ih, b_hh = params["b_ih"], params["b_hh"]
    zero_blk = jnp.zeros((hd, hd), jnp.float32)
    w_gru = jnp.concatenate([
        jnp.concatenate([w_ih[:, :hd], w_ih[:, hd:2 * hd], w_ih[:, 2 * hd:], zero_blk], axis=1),
        jnp.concatenate([w_hh[:, :hd], w_hh[:, hd:2 * hd], zero_blk, w_hh[:, 2 * hd:]], axis=1),
    ], axis=0)                                              # [2H, 4H]
    b_gru = jnp.concatenate([
        b_ih[:, :hd] + b_hh[:, :hd],                        # b_r
        b_ih[:, hd:2 * hd] + b_hh[:, hd:2 * hd],            # b_z
        b_ih[:, 2 * hd:],                                   # b_in
        b_hh[:, 2 * hd:],                                   # b_hn
    ], axis=1)                                              # [1, 4H] f32

    # fc padded to a lane-dense 128-wide output (zero columns sliced off below).
    pad = NUM_ITEMS_PAD - NUM_ITEMS
    w_fc_p = jnp.pad(params["w_fc"], ((0, 0), (0, pad)))
    b_fc_p = jnp.pad(params["b_fc"], ((0, 0), (0, pad)))

    # MXU operands pre-cast to bf16 in the wrapper; biases stay f32.
    packed = (
        params["w_msg"].astype(bf16), params["b_msg"],
        w_gru.astype(bf16), b_gru,
        w_fc_p.astype(bf16), b_fc_p,
    )

    # TODO(synk): dropout is identity in eval mode; training-mode RNG dropout not implemented.
    scores_padded = sr_gnn_pallas(x.astype(bf16), a_norm.astype(bf16),
                                  pool.astype(bf16), packed)
    return scores_padded[:, :NUM_ITEMS]                     # un-pad under jit (cheap slice)


# Whole forward (gathers + scatter-add + pool build + pallas_call) under one jit;
# num_graphs is shape-determining -> static.
sr_gnn_forward = jax.jit(_sr_gnn_forward, static_argnums=(9,))


# --------------------------------- main --------------------------------------
if __name__ == "__main__":
    key = jax.random.PRNGKey(0)
    kp, kd = jax.random.split(key)
    params = build_params(kp)

    # synthetic "data" batch: 12 nodes across 2 graphs, 16 directed edges
    N_NODES = 12
    N_EDGES = 16
    NUM_GRAPHS = 2
    kds = jax.random.split(kd, 8)
    price = jax.random.normal(kds[0], (N_NODES, 1), jnp.float32)
    category = jax.random.randint(kds[1], (N_NODES,), 0, NUM_CATEGORIES)
    sub_category = jax.random.randint(kds[2], (N_NODES,), 0, NUM_SUB_CATEGORIES)
    element = jax.random.randint(kds[3], (N_NODES,), 0, NUM_ELEMENTS)
    brand = jax.random.randint(kds[4], (N_NODES,), 0, NUM_BRANDS)
    product_id = jax.random.randint(kds[5], (N_NODES,), 0, NUM_ITEMS)
    edge_index = jax.random.randint(kds[6], (2, N_EDGES), 0, N_NODES)
    batch = jnp.concatenate([jnp.zeros(6, jnp.int32), jnp.ones(6, jnp.int32)])

    scores = sr_gnn_forward(params, price, category, sub_category, element,
                            brand, product_id, edge_index, batch, NUM_GRAPHS)
    scores = jax.block_until_ready(scores)
    assert scores.shape == (NUM_GRAPHS, NUM_ITEMS)
    assert bool(jnp.all(jnp.isfinite(scores)))
    print("KERNEL_OK")
</pallas_src>

<mosaic_0001>
module attributes {stable_mosaic.version = 11 : i64} {
  func.func @_sr_gnn_kernel(%arg0: memref<12x41xbf16, #tpu.memory_space<vmem>>, %arg1: memref<12x12xbf16, #tpu.memory_space<vmem>>, %arg2: memref<2x12xbf16, #tpu.memory_space<vmem>>, %arg3: memref<41x32xbf16, #tpu.memory_space<vmem>>, %arg4: memref<1x32xf32, #tpu.memory_space<vmem>>, %arg5: memref<64x128xbf16, #tpu.memory_space<vmem>>, %arg6: memref<1x128xf32, #tpu.memory_space<vmem>>, %arg7: memref<32x128xbf16, #tpu.memory_space<vmem>>, %arg8: memref<1x128xf32, #tpu.memory_space<vmem>>, %arg9: memref<2x128xf32, #tpu.memory_space<vmem>>) attributes {dimension_semantics = [], scalar_prefetch = 0 : i64, scratch_operands = 0 : i64, tpu.core_type = #tpu.core_type<tc>} {
    %c0 = arith.constant 0 : index
    %c0_0 = arith.constant 0 : index
    %0 = vector.load %arg0[%c0, %c0_0] : memref<12x41xbf16, #tpu.memory_space<vmem>>, vector<12x41xbf16>
    %c0_1 = arith.constant 0 : index
    %c0_2 = arith.constant 0 : index
    %1 = vector.load %arg1[%c0_1, %c0_2] : memref<12x12xbf16, #tpu.memory_space<vmem>>, vector<12x12xbf16>
    %c0_3 = arith.constant 0 : index
    %c0_4 = arith.constant 0 : index
    %2 = vector.load %arg2[%c0_3, %c0_4] : memref<2x12xbf16, #tpu.memory_space<vmem>>, vector<2x12xbf16>
    %c0_5 = arith.constant 0 : index
    %c0_6 = arith.constant 0 : index
    %3 = vector.load %arg5[%c0_5, %c0_6] : memref<64x128xbf16, #tpu.memory_space<vmem>>, vector<64x128xbf16>
    %c0_7 = arith.constant 0 : index
    %c0_8 = arith.constant 0 : index
    %4 = vector.load %arg6[%c0_7, %c0_8] : memref<1x128xf32, #tpu.memory_space<vmem>>, vector<1x128xf32>
    %c0_9 = arith.constant 0 : index
    %c0_10 = arith.constant 0 : index
    %5 = vector.load %arg3[%c0_9, %c0_10] : memref<41x32xbf16, #tpu.memory_space<vmem>>, vector<41x32xbf16>
    %cst = arith.constant dense<0.000000e+00> : vector<12x32xf32>
    %6 = tpu.matmul %0, %5, %cst {dimension_numbers = #tpu.dot_dimension_numbers<[1], [0], [0], [1], [0, 0, 1, 1], [], []>} : vector<12x41xbf16>, vector<41x32xbf16>, vector<12x32xf32> -> vector<12x32xf32>
    %c0_11 = arith.constant 0 : index
    %c0_12 = arith.constant 0 : index
    %7 = vector.load %arg4[%c0_11, %c0_12] : memref<1x32xf32, #tpu.memory_space<vmem>>, vector<1x32xf32>
    %8 = vector.broadcast %7 : vector<1x32xf32> to vector<12x32xf32>
    %9 = arith.addf %6, %8 : vector<12x32xf32>
    %10 = arith.truncf %9 : vector<12x32xf32> to vector<12x32xbf16>
    %cst_13 = arith.constant dense<0.000000e+00> : vector<12x32xf32>
    %11 = tpu.matmul %1, %10, %cst_13 {dimension_numbers = #tpu.dot_dimension_numbers<[1], [0], [0], [1], [0, 0, 1, 1], [], []>} : vector<12x12xbf16>, vector<12x32xbf16>, vector<12x32xf32> -> vector<12x32xf32>
    %12 = arith.truncf %11 : vector<12x32xf32> to vector<12x32xbf16>
    %13 = tpu.concatenate %12, %10 in 1 : vector<12x32xbf16>, vector<12x32xbf16> -> vector<12x64xbf16>
    %cst_14 = arith.constant dense<0.000000e+00> : vector<12x128xf32>
    %14 = tpu.matmul %13, %3, %cst_14 {dimension_numbers = #tpu.dot_dimension_numbers<[1], [0], [0], [1], [0, 0, 1, 1], [], []>} : vector<12x64xbf16>, vector<64x128xbf16>, vector<12x128xf32> -> vector<12x128xf32>
    %15 = vector.broadcast %4 : vector<1x128xf32> to vector<12x128xf32>
    %16 = arith.addf %14, %15 : vector<12x128xf32>
    %17 = vector.extract_strided_slice %16 {offsets = [0, 0], sizes = [12, 32], strides = [1, 1]} : vector<12x128xf32> to vector<12x32xf32>
    %18 = arith.negf %17 : vector<12x32xf32>
    %19 = math.exp %18 : vector<12x32xf32>
    %cst_15 = arith.constant 1.000000e+00 : f32
    %20 = vector.broadcast %cst_15 : f32 to vector<12x32xf32>
    %21 = arith.addf %20, %19 : vector<12x32xf32>
    %22 = arith.divf %20, %21 : vector<12x32xf32>
    %23 = vector.extract_strided_slice %16 {offsets = [0, 32], sizes = [12, 32], strides = [1, 1]} : vector<12x128xf32> to vector<12x32xf32>
    %24 = arith.negf %23 : vector<12x32xf32>
    %25 = math.exp %24 : vector<12x32xf32>
    %cst_16 = arith.constant 1.000000e+00 : f32
    %26 = vector.broadcast %cst_16 : f32 to vector<12x32xf32>
    %27 = arith.addf %26, %25 : vector<12x32xf32>
    %28 = arith.divf %26, %27 : vector<12x32xf32>
    %29 = vector.extract_strided_slice %16 {offsets = [0, 64], sizes = [12, 32], strides = [1, 1]} : vector<12x128xf32> to vector<12x32xf32>
    %30 = vector.extract_strided_slice %16 {offsets = [0, 96], sizes = [12, 32], strides = [1, 1]} : vector<12x128xf32> to vector<12x32xf32>
    %31 = arith.mulf %22, %30 : vector<12x32xf32>
    %32 = arith.addf %29, %31 : vector<12x32xf32>
    %33 = math.tanh %32 : vector<12x32xf32>
    %cst_17 = arith.constant 1.000000e+00 : f32
    %34 = vector.broadcast %cst_17 : f32 to vector<12x32xf32>
    %35 = arith.subf %34, %28 : vector<12x32xf32>
    %36 = arith.mulf %35, %33 : vector<12x32xf32>
    %37 = arith.mulf %28, %9 : vector<12x32xf32>
    %38 = arith.addf %36, %37 : vector<12x32xf32>
    %39 = arith.truncf %38 : vector<12x32xf32> to vector<12x32xbf16>
    %cst_18 = arith.constant dense<0.000000e+00> : vector<2x32xf32>
    %40 = tpu.matmul %2, %39, %cst_18 {dimension_numbers = #tpu.dot_dimension_numbers<[1], [0], [0], [1], [0, 0, 1, 1], [], []>} : vector<2x12xbf16>, vector<12x32xbf16>, vector<2x32xf32> -> vector<2x32xf32>
    %41 = arith.truncf %40 : vector<2x32xf32> to vector<2x32xbf16>
    %c0_19 = arith.constant 0 : index
    %c0_20 = arith.constant 0 : index
    %42 = vector.load %arg7[%c0_19, %c0_20] : memref<32x128xbf16, #tpu.memory_space<vmem>>, vector<32x128xbf16>
    %cst_21 = arith.constant dense<0.000000e+00> : vector<2x128xf32>
    %43 = tpu.matmul %41, %42, %cst_21 {dimension_numbers = #tpu.dot_dimension_numbers<[1], [0], [0], [1], [0, 0, 1, 1], [], []>} : vector<2x32xbf16>, vector<32x128xbf16>, vector<2x128xf32> -> vector<2x128xf32>
    %c0_22 = arith.constant 0 : index
    %c0_23 = arith.constant 0 : index
    %44 = vector.load %arg8[%c0_22, %c0_23] : memref<1x128xf32, #tpu.memory_space<vmem>>, vector<1x128xf32>
    %45 = vector.broadcast %44 : vector<1x128xf32> to vector<2x128xf32>
    %46 = arith.addf %43, %45 : vector<2x128xf32>
    %c0_24 = arith.constant 0 : index
    %c0_25 = arith.constant 0 : index
    %47 = vector.load %arg9[%c0_24, %c0_25] : memref<2x128xf32, #tpu.memory_space<vmem>>, vector<2x128xf32>
    tpu.vector_store %arg9[%c0_24, %c0_25], %46 {strides = array<i32>} : memref<2x128xf32, #tpu.memory_space<vmem>>, vector<2x128xf32>,
    return
  }
}

</mosaic_0001>

<bundles_post_ra>
// kernel: _sr_gnn_forward.1
= control target key start
LH: loop header
LB: loop body
LE: loop exit
PB: predicated region body
PF: predicated region fallthrough
CT: control target
= control target key end

     0   :  { %vm84_vm0 = vcmask 1043456   ;;  %vm85_vm1 = vcmask 1044480   ;;  %v465_v3 = vmov 65535   ;;  %s598_s0 = inlined_call_operand.vmem [shape: bf16[12,41], index: 0, kind: input, shape index: {}]   ;;  %s599_s1 = inlined_call_operand.vmem [shape: bf16[12,12], index: 1, kind: input, shape index: {}]   ;;  %s600_s2 = inlined_call_operand.vmem [shape: bf16[2,12], index: 2, kind: input, shape index: {}]   ;;  %s601_s3 = inlined_call_operand.vmem [shape: bf16[41,32], index: 3, kind: input, shape index: {}]   ;;  %s602_s4 = inlined_call_operand.vmem [shape: f32[1,32], index: 4, kind: input, shape index: {}]   ;;  %s603_s5 = inlined_call_operand.vmem [shape: bf16[64,128], index: 5, kind: input, shape index: {}]   ;;  %s604_s6 = inlined_call_operand.vmem [shape: f32[1,128], index: 6, kind: input, shape index: {}]   ;;  %s605_s7 = inlined_call_operand.vmem [shape: bf16[32,128], index: 7, kind: input, shape index: {}]   ;;  %s606_s8 = inlined_call_operand.vmem [shape: f32[1,128], index: 8, kind: input, shape index: {}]   ;;  %s607_s9 = inlined_call_operand.hbm [shape: f32[2,128], index: 9, kind: output, shape index: {}]  }
   0x1   :  { %v371_v0 = vld [vmem:[%s601_s3 + $0x10] sm:$0xf]  ;;  %v416_v1 = vld [vmem:[%s601_s3 + $0x10] sm:$0x10]  ;;  %v86_v4 = vsel %vm84_vm0, 4294967295, %v465_v3 }
   0x2   :  { %v372_v2 = vor.u32 %v416_v1, %v371_v0  ;;  %v87_v5 = vsel %vm85_vm1, %v86_v4, 0 }
   0x4   :  { %v89_v6 = vand.u32 %v372_v2, %v87_v5 }
   0x5   :  { %14 = vsyncpa [#allocation3], 0  ;;  %v415_v7 = vld [vmem:[%s601_s3 + $0x8] sm:$0xff]  ;;  %v414_v8 = vld [vmem:[%s601_s3] sm:$0xff]  ;;  %vm80_vm2 = vcmask 334848   ;;  %vm121_vm3 = vcmask 1045504  }
   0x6   :  { %96 = vmatpush.bf16.msra.mxu0 %v89_v6  ;;  %v359_v9 = vld [vmem:[%s598_s0] sm:$0xf]  ;;  %v408_v10 = vld [vmem:[%s598_s0] sm:$0x30]  ;;  %s466_s24 = smov 32   ;;  %vm117_vm4 = vcmask 97280  }
   0x7   :  { %v360_v11 = vor.u32 %v408_v10, %v359_v9  ;;  %v424_v13 = vld [vmem:[%s602_s4] ss:$0 sm:$0xff]  ;;  %v409_v22 = vld [vmem:[%s599_s1] sm:$0x30]  ;;  %v413_v26 = vld [vmem:[%s603_s5 + $0x18] sm:$0xff]  ;;  %vm148_vm5 = vcmask 261120  }
   0x8   :  { %v376_v21 = vld [vmem:[%s599_s1] sm:$0xf]  ;;  %186 = vmatpush.bf16.msra.mxu2 %v413_v26  ;;  %v412_v27 = vld [vmem:[%s603_s5 + $0x10] sm:$0xff]  ;;  %v411_v28 = vld [vmem:[%s603_s5 + $0x8] sm:$0xff]  ;;  %vm179_vm6 = vcmask 523264   ;;  %s348_s3 = sshll.u32 %s607_s9, 4  ;;  %s349_s3 = int_to_ptr.hbm [resolvable:$true] %s348_s3 }
   0x9   :  { %v377_v25 = vor.u32 %v409_v22, %v376_v21  ;;  %v410_v29 = vld [vmem:[%s603_s5] sm:$0xff]  ;;  %s467_s5 = smov 64  }
   0xa   :  { %97 = vmatpush.bf16.msra.mxu0 %v415_v7  ;;  %v425_v39 = vld [vmem:[%s604_s6] ss:$0 sm:$0xff]  ;;  %s468_s6 = smov 96  }
   0xc   :  { %187 = vmatpush.bf16.msra.mxu2 %v412_v27 }
   0xe   :  { %98 = vmatpush.bf16.msra.mxu0 %v414_v8 }
  0x10   :  { %188 = vmatpush.bf16.msra.mxu2 %v411_v28 }
  0x11   :  { %373 = vmatmul.msk.bf16.vlgmr.msra.gmra.mxu0 %vm80_vm2, %v360_v11 }
  0x14   :  { %189 = vmatpush.bf16.msra.mxu2 %v410_v29 }
  0x8e   :  { %v100_v12 = vpop.f32.mrf.mxu0 }
  0x8f   :  { %v541_v14 = vadd.f32 %v424_v13, %v100_v12 }
  0x91   :  { %v105_v16 = vpack.c.bf16 %v541_v14, %v541_v14 }
  0x93   :  { %v114_v19 = vunpack.c.l.b16 %v105_v16 }
  0x96   :  { %v102_v15 = vpop.f32.mrf.mxu0 }
  0x97   :  { %v545_v17 = vadd.f32 %v424_v13, %v102_v15 }
  0x99   :  { %v106_v18 = vpack.c.bf16 %v545_v17, %v545_v17 }
  0x9b   :  { %v115_v20 = vunpack.c.l.b16 %v106_v18 }
  0x9d   :  { %v116_v23 = vpack.c.b16 %v115_v20, %v114_v19 }
  0x9f   :  { %146 = vrot.lane.b32.xlu0 %v116_v23, %s466_s24  ;;  %v123_v24 = vsel %vm121_vm3, %v116_v23, 0 }
  0xa0   :  { %132 = vmatpush.bf16.msra.mxu1 %v123_v24 }
  0xa3   :  { %378 = vmatmul.msk.bf16.vlgmr.msra.gmra.mxu1 %vm117_vm4, %v377_v25 }
 0x111   :  { %v147_v37 = vpop.permute.xlu0 %146 }
 0x120   :  { %v134_v30 = vpop.f32.mrf.mxu1 }
 0x121   :  { %v139_v31 = vpack.c.bf16 %v134_v30, %v134_v30  ;;  %v418_v30 = vld [vmem:[%s605_s7 + $0x8] sm:$0xff] }
 0x122   :  { %333 = vmatpush.bf16.msrb.mxu1 %v418_v30 }
 0x123   :  { %v143_v34 = vunpack.c.l.b16 %v139_v31 }
 0x128   :  { %v136_v32 = vpop.f32.mrf.mxu1 }
 0x129   :  { %v140_v33 = vpack.c.bf16 %v136_v32, %v136_v32 }
 0x12b   :  { %v144_v35 = vunpack.c.l.b16 %v140_v33  ;;  %v38_v33 = vld [vmem:[%s600_s2] sm:$0x1] }
 0x12d   :  { %v145_v36 = vpack.c.b16 %v144_v35, %v143_v34 }
 0x12f   :  { %v151_v38 = vsel %vm148_vm5, %v145_v36, %v147_v37  ;;  %v426_v37 = vld [vmem:[%s606_s8] ss:$0 sm:$0xff] }
 0x130   :  { %395 = vmatmul.msk.bf16.vlgmr.msra.gmra.mxu2 %vm179_vm6, %v151_v38 }
 0x1b3   :  { %v191_v40 = vpop.f32.mrf.mxu2 }
 0x1b4   :  { %v192_v41 = vadd.f32 %v425_v39, %v191_v40 }
 0x1b6   :  { %236 = vrot.lane.b32.xlu0 %v192_v41, %s466_s24  ;;  %v396_v44 = vmul.f32 -1.442695, %v192_v41 }
 0x1b8   :  { %427 = vpow2.f32 %v396_v44 }
 0x1bb   :  { %v193_v42 = vpop.f32.mrf.mxu2 }
 0x1bc   :  { %v194_v43 = vadd.f32 %v425_v39, %v193_v42 }
 0x1be   :  { %238 = vrot.lane.b32.xlu1 %v194_v43, %s466_s24  ;;  %v397_v45 = vmul.f32 -1.442695, %v194_v43  ;;  %v428_v46 = vpop.eup %427 }
 0x1bf   :  { %v202_v47 = vadd.f32 1.0, %v428_v46 }
 0x1c0   :  { %429 = vpow2.f32 %v397_v45 }
 0x1c1   :  { %431 = vrcp.f32 %v202_v47  ;;  %v215_v58 = vand.u32 2147483648, %v202_v47  ;;  %vm209_vm8 = vweird.f32 %v202_v47  ;;  %v213_v59 = vand.u32 2147483647, %v202_v47 }
 0x1c3   :  { %v216_v62 = vor.u32 1.1754944e-38, %v215_v58  ;;  %vm214_vm10 = vcmp.eq.f32.partialorder %v213_v59, 8.507059e+37 }
 0x1c6   :  { %v430_v48 = vpop.eup %429 }
 0x1c7   :  { %v203_v49 = vadd.f32 1.0, %v430_v48  ;;  %v432_v50 = vpop.eup %431 }
 0x1c8   :  { %v205_v51 = vmul.f32 %v432_v50, %v202_v47  ;;  %vm210_vm7 = vweird.f32 %v432_v50 }
 0x1c9   :  { %433 = vrcp.f32 %v203_v49  ;;  %vm211_vm9 = vmor %vm209_vm8, %vm210_vm7  ;;  %v230_v3 = vand.u32 2147483648, %v203_v49  ;;  %vm224_vm12 = vweird.f32 %v203_v49  ;;  %v228_v4 = vand.u32 2147483647, %v203_v49 }
 0x1ca   :  { %v206_v52 = vsub.f32 1.0, %v205_v51 }
 0x1cb   :  { %v231_v6 = vor.u32 1.1754944e-38, %v230_v3  ;;  %vm229_vm14 = vcmp.eq.f32.partialorder %v228_v4, 8.507059e+37 }
 0x1cc   :  { %v207_v54 = vmul.f32 %v432_v50, %v206_v52 }
 0x1ce   :  { %v208_v56 = vadd.f32 %v432_v50, %v207_v54 }
 0x1cf   :  { %v434_v53 = vpop.eup %433 }
 0x1d0   :  { %v220_v55 = vmul.f32 %v434_v53, %v203_v49  ;;  %v212_v60 = vsel %vm211_vm9, %v432_v50, %v208_v56  ;;  %vm225_vm11 = vweird.f32 %v434_v53 }
 0x1d1   :  { %v217_v0 = vsel %vm214_vm10, %v216_v62, %v212_v60  ;;  %vm226_vm13 = vmor %vm224_vm12, %vm225_vm11 }
 0x1d2   :  { %v221_v57 = vsub.f32 1.0, %v220_v55  ;;  %v256_v19 = vsub.f32 1.0, %v217_v0 }
 0x1d4   :  { %v222_v61 = vmul.f32 %v434_v53, %v221_v57 }
 0x1d6   :  { %v223_v2 = vadd.f32 %v434_v53, %v222_v61 }
 0x1d8   :  { %v227_v5 = vsel %vm226_vm13, %v434_v53, %v223_v2 }
 0x1d9   :  { %v232_v8 = vsel %vm229_vm14, %v231_v6, %v227_v5 }
 0x1da   :  { %v257_v22 = vsub.f32 1.0, %v232_v8 }
 0x228   :  { %v237_v63 = vpop.permute.xlu0 %236 }
 0x229   :  { %v242_v1 = vmul.f32 %v237_v63, %v217_v0 }
 0x22b   :  { %246 = vrot.lane.b32.xlu1 %v242_v1, %s467_s5 }
 0x230   :  { %v239_v7 = vpop.permute.xlu1 %238 }
 0x231   :  { %v243_v9 = vmul.f32 %v239_v7, %v232_v8 }
 0x233   :  { %248 = vrot.lane.b32.xlu2 %v243_v9, %s467_s5  ;;  %270 = vrot.lane.b32.xlu1 %v541_v14, %s466_s24 }
 0x28d   :  { %v249_v10 = vpop.permute.xlu2 %248 }
 0x28e   :  { %v253_v11 = vadd.f32 %v249_v10, %v194_v43 }
 0x290   :  { %435 = vtanh.f32 %v253_v11 }
 0x296   :  { %v436_v12 = vpop.eup %435 }
 0x297   :  { %262 = vrot.lane.b32.xlu0 %v436_v12, %s468_s6 }
 0x29d   :  { %v247_v13 = vpop.permute.xlu1 %246 }
 0x29e   :  { %v252_v15 = vadd.f32 %v247_v13, %v192_v41 }
 0x2a0   :  { %437 = vtanh.f32 %v252_v15 }
 0x2a5   :  { %v271_v20 = vpop.permute.xlu1 %270 }
 0x2a6   :  { %v438_v16 = vpop.eup %437  ;;  %v276_v24 = vmul.f32 %v271_v20, %v217_v0 }
 0x2a7   :  { %260 = vrot.lane.b32.xlu2 %v438_v16, %s468_s6 }
 0x2af   :  { %272 = vrot.lane.b32.xlu2 %v545_v17, %s466_s24  ;;  %v417_v17 = vld [vmem:[%s605_s7] sm:$0xff]  ;;  %s469_s7 = smov [#allocation2]  }
 0x2b0   :  { %334 = vmatpush.bf16.msrb.mxu1 %v417_v17  ;;  %s346_s21 = sshll.u32 %s469_s7, 4  ;;  %s347_s21 = int_to_ptr.vmem [resolvable:$true] %s346_s21 }
 0x301   :  { %v261_v18 = vpop.permute.xlu2 %260 }
 0x302   :  { %v266_v21 = vmul.f32 %v261_v18, %v256_v19 }
 0x304   :  { %v278_v27 = vadd.f32 %v276_v24, %v266_v21 }
 0x309   :  { %v263_v14 = vpop.permute.xlu0 %262  ;;  %v273_v23 = vpop.permute.xlu2 %272 }
 0x30a   :  { %v267_v25 = vmul.f32 %v263_v14, %v257_v22  ;;  %v277_v26 = vmul.f32 %v273_v23, %v232_v8 }
 0x30c   :  { %v279_v28 = vadd.f32 %v277_v26, %v267_v25 }
 0x30e   :  { %v280_v29 = vpack.c.bf16 %v279_v28, %v278_v27 }
 0x310   :  { %282 = vrot.lane.b32.xlu0 %v280_v29, %s468_s6 }
 0x382   :  { %v283_v31 = vpop.permute.xlu0 %282 }
 0x383   :  { %v288_v32 = vsel %vm121_vm3, %v283_v31, 0 }
 0x384   :  { %297 = vmatpush.bf16.msra.mxu3 %v288_v32 }
 0x387   :  { %398 = vmatmul.msk.bf16.vlgmr.msra.gmra.mxu3 %vm117_vm4, %v38_v33 }
 0x40a   :  { %v299_v34 = vpop.f32.mrf.mxu3 }
 0x40b   :  { %v303_v35 = vpack.c.bf16 %v299_v34, %v299_v34 }
 0x40d   :  { %407 = vmatmul.msk.bf16.vlgmr.msrb.gmra.mxu1 %vm148_vm5, %v303_v35 }
 0x412   :  { %v301_v36 = vpop.f32.mrf.mxu3 }
 0x48a   :  { %v336_v38 = vpop.f32.mrf.mxu1 }
 0x48b   :  { %v337_v39 = vadd.f32 %v426_v37, %v336_v38 }
 0x48d   :  { %340 = vst [vmem:[#allocation2] sm:$0x3] %v337_v39 }
 0x48e   :  { %351 = dma.vmem_to_hbm [thread:$0]  %s347_s21, 32, %s349_s3, [#allocation3]  }
 0x492   :  { %v338_v40 = vpop.f32.mrf.mxu1 }
 0x493   :  { %463 = dma.done.wait [#allocation3], 32  }
 0x494   :  { %464 = vsyncadd [#allocation3], 4294967264 }
 0x495   :  { %356 = vsyncpa [#allocation3], 1 }

</bundles_post_ra>
